<compile_context>
chip_gen: v7x
topology: tpu7x:2x2x1
jax: 0.10.0
libtpu: 0.0.40
codegen_flags: <defaults>
</compile_context>

<pallas_src>
import functools

import numpy as np

import jax
import jax.numpy as jnp
from jax.experimental import pallas as pl
from jax.experimental.pallas import tpu as pltpu

_EPS = 1e-8  # torch.nn.CosineSimilarity default eps


def _round_up(v, m):
    return ((v + m - 1) // m) * m


def _pad_dim(d):
    # Lane (last) dims: keep the full extent when small/aligned (block == full dim is
    # legal; Mosaic masks sub-128 lanes), otherwise pad to a multiple of 128.
    return d if (d <= 128 or d % 128 == 0) else _round_up(d, 128)


def _vmem_capacity_bytes():
    try:
        return int(pltpu.get_tpu_info().vmem_capacity_bytes)
    except Exception:
        return None


def _has_low_precision_vpu():
    # v6e / v7x have a bf16 VPU; v5e (and earlier) do not -> keep relu^2 in f32 there.
    try:
        kind = jax.devices()[0].device_kind.lower()
    except Exception:
        return False
    return ("v6" in kind) or ("v7" in kind)


def ppm_kernel(xn_i_ref, xn_m_ref, tx_m_ref, o_ref, *, square_in_matmul_dtype):
    # xn_i_ref: (T, Cp)  row-normalized x, "query" (i) tile
    # xn_m_ref: (T, Cp)  row-normalized x, "key"   (m) tile
    # tx_m_ref: (T, Op)  1x1-conv-transformed x, m tile
    # o_ref:    (T, Op)  f32 output tile, resident across the m axis (accumulator)
    m = pl.program_id(2)

    @pl.when(m == 0)
    def _():
        o_ref[...] = jnp.zeros_like(o_ref)

    # Pairwise cosine-similarity block: rows are pre-normalized, so this is a plain
    # gram matmul (contract the channel / last dims of both operands). f32 accumulate.
    dn = (((1,), (1,)), ((), ()))
    sim = jax.lax.dot_general(
        xn_i_ref[...], xn_m_ref[...], dn, preferred_element_type=jnp.float32
    )  # (T, T) f32

    if square_in_matmul_dtype:
        # v6e/v7x: bf16 VALU packs 2x elements per vreg; halves the square pass and
        # the staged-p store traffic.
        r = jnp.maximum(sim, 0.0).astype(tx_m_ref.dtype)
        p = r * r
    else:
        # v5e / f32 path: no bf16 VPU -> square in f32, then cast for the MXU.
        p = jnp.square(jnp.maximum(sim, 0.0)).astype(tx_m_ref.dtype)

    # out[n, o] += sum_m p[n, m] * tx[m, o]   (low-precision inputs, f32 accumulation
    # directly into the resident output tile).
    o_ref[...] += jnp.dot(p, tx_m_ref[...], preferred_element_type=jnp.float32)


@functools.partial(jax.jit, static_argnames=("matmul_dtype", "tile_n"))
def ppm_forward(x_nchw, weight, bias, *, matmul_dtype=jnp.bfloat16, tile_n=None):
    """x_nchw: (B, C, H, W); weight: (O, C) (1x1 conv kernel squeezed); bias: (O,)."""
    b, c, h, w = x_nchw.shape
    o = weight.shape[0]
    n = h * w

    # ---- cheap O(N*C) preprocessing in plain JAX (fuses with the layout transpose) ----
    # TODO(synk): accept channels-last input upstream to avoid this NCHW->NHWC pass.
    xf = jnp.transpose(x_nchw, (0, 2, 3, 1)).reshape(b, n, c).astype(jnp.float32)
    ss = jnp.sum(xf * xf, axis=-1, keepdims=True)
    inv_norm = jax.lax.rsqrt(jnp.maximum(ss, _EPS * _EPS))  # == 1 / max(||x||, eps)
    xn = xf * inv_norm                                       # unit rows (cosine pre-norm)
    tx = xf @ weight.astype(jnp.float32).T + bias.astype(jnp.float32)[None, None, :]

    # ---- tiling / padding: lane-dense channel dims only when needed, tile % 128 == 0 ----
    cp = _pad_dim(c)
    op = _pad_dim(o)

    vmem_cap = _vmem_capacity_bytes()
    if tile_n is None:
        # Generation-aware default: 2048 on v5e/v6e (128 MiB VMEM), 1024 on v7x (64 MiB)
        # or when the capacity cannot be queried.
        tile_n = 2048 if (vmem_cap is not None and vmem_cap >= (100 << 20)) else 1024

    tile = max(128, _round_up(min(int(tile_n), _round_up(n, 128)), 128))
    np_ = _round_up(n, tile)
    if b * (np_ // tile) < 2 and np_ > 128:
        # Keep the combined "parallel" grid extent >= 2 so v7x's 2nd TensorCore is used.
        tile = _round_up(-(-np_ // 2), 128)
        np_ = _round_up(n, tile)

    # Padding AFTER normalization and AFTER the bias add (see correctness note above).
    xn_p = jnp.pad(xn, ((0, 0), (0, np_ - n), (0, cp - c))).astype(matmul_dtype)
    tx_p = jnp.pad(tx, ((0, 0), (0, np_ - n), (0, op - o))).astype(matmul_dtype)

    itemsize = int(np.dtype(matmul_dtype).itemsize)
    # Per-step VMEM footprint: double-buffered tiles + (T, T) sim / p staging.
    step_bytes = (
        2 * tile * cp * itemsize      # xn_i tile (double-buffered)
        + 2 * tile * cp * itemsize    # xn_m tile
        + 2 * tile * op * itemsize    # tx_m tile
        + 2 * tile * op * 4           # f32 output tile (double-buffered)
        + tile * tile * 4             # (T, T) f32 sim staging
        + tile * tile * itemsize      # (T, T) p staging
    )
    vmem_limit = max(32 << 20, step_bytes + (8 << 20))
    vmem_limit = int(
        min(vmem_limit, (vmem_cap - (8 << 20)) if vmem_cap else (64 << 20))
    )

    n_i = np_ // tile
    grid = (b, n_i, n_i)

    flops = int(2 * b * np_ * np_ * (cp + op))  # gram matmul + p @ tx
    bytes_accessed = int(
        b * np_ * cp * itemsize                      # xn_i read once per i-tile sweep
        + b * n_i * np_ * (cp + op) * itemsize       # xn_m + tx_m streamed per (i, m)
        + b * np_ * op * 4                           # f32 output written once
    )

    square_lp = (np.dtype(matmul_dtype) != np.dtype(jnp.float32)) and _has_low_precision_vpu()
    kernel = functools.partial(ppm_kernel, square_in_matmul_dtype=square_lp)

    out_p = pl.pallas_call(
        kernel,
        out_shape=jax.ShapeDtypeStruct((b, np_, op), jnp.float32),
        grid_spec=pltpu.PrefetchScalarGridSpec(
            num_scalar_prefetch=0,
            grid=grid,
            in_specs=[
                pl.BlockSpec((None, tile, cp), lambda bi, i, m: (bi, i, 0)),  # xn i-tile
                pl.BlockSpec((None, tile, cp), lambda bi, i, m: (bi, m, 0)),  # xn m-tile
                pl.BlockSpec((None, tile, op), lambda bi, i, m: (bi, m, 0)),  # tx m-tile
            ],
            out_specs=pl.BlockSpec((None, tile, op), lambda bi, i, m: (bi, i, 0)),
        ),
        compiler_params=pltpu.CompilerParams(
            dimension_semantics=("parallel", "parallel", "arbitrary"),
            vmem_limit_bytes=vmem_limit,
        ),
        cost_estimate=pl.CostEstimate(
            flops=flops, transcendentals=0, bytes_accessed=bytes_accessed
        ),
    )(xn_p, xn_p, tx_p)

    out = out_p[:, :n, :o]                                   # strip N / O padding
    return jnp.transpose(out.reshape(b, h, w, o), (0, 3, 1, 2))


def ppm_reference(x, weight, bias, eps=_EPS):
    """Pure-JAX reference mirroring the PyTorch module."""
    b, c, h, w = x.shape
    xf = x.reshape(b, c, h * w)                                            # (B, C, N)
    norms = jnp.maximum(jnp.sqrt(jnp.sum(xf * xf, axis=1)), eps)           # (B, N)
    gram = jnp.einsum('bcn,bcm->bnm', xf, xf)                              # (B, N, N)
    sim = gram / (norms[:, :, None] * norms[:, None, :])
    p = jnp.square(jnp.maximum(sim, 0.0))
    tx = jnp.einsum('oc,bcn->bon', weight, xf) + bias[None, :, None]       # (B, O, N)
    out = jnp.einsum('bnm,bom->bon', p, tx)                                # (B, O, N)
    return out.reshape(b, weight.shape[0], h, w)


if __name__ == "__main__":
    # Small, module-consistent shapes. tile_n=128 < N exercises the m-accumulation /
    # multi-tile path; C=32, O=48 exercise the un-padded (<128) lane-dim path.
    B, C_IN, C_OUT, H, W = 2, 32, 48, 16, 16

    key = jax.random.PRNGKey(0)
    kx, kw, kb = jax.random.split(key, 3)
    x = jax.random.normal(kx, (B, C_IN, H, W), dtype=jnp.float32)
    conv_weight = jax.random.normal(kw, (C_OUT, C_IN), dtype=jnp.float32) * (1.0 / jnp.sqrt(C_IN))
    conv_bias = jax.random.normal(kb, (C_OUT,), dtype=jnp.float32) * 0.01

    ref = ppm_reference(x, conv_weight, conv_bias)

    # f32 matmul path with a small tile: tight correctness check, exercises accumulation.
    out_f32 = jax.block_until_ready(
        ppm_forward(x, conv_weight, conv_bias, matmul_dtype=jnp.float32, tile_n=128)
    )
    assert out_f32.shape == (B, C_OUT, H, W), out_f32.shape
    assert jnp.allclose(out_f32, ref, rtol=1e-4, atol=1e-4), float(
        jnp.max(jnp.abs(out_f32 - ref))
    )

    # bf16 matmul path with the auto (generation-aware) tile: looser tolerance.
    out_bf16 = jax.block_until_ready(
        ppm_forward(x, conv_weight, conv_bias, matmul_dtype=jnp.bfloat16)
    )
    assert out_bf16.shape == (B, C_OUT, H, W), out_bf16.shape
    assert jnp.allclose(out_bf16, ref, rtol=5e-2, atol=5e-2), float(
        jnp.max(jnp.abs(out_bf16 - ref))
    )

    print("KERNEL_OK")
</pallas_src>

<mosaic_0001>
module attributes {stable_mosaic.version = 11 : i64} {
  func.func @ppm_kernel(%arg0: i32, %arg1: i32, %arg2: i32, %arg3: memref<1x128x32xf32, #tpu.memory_space<vmem>>, %arg4: memref<1x128x32xf32, #tpu.memory_space<vmem>>, %arg5: memref<1x128x48xf32, #tpu.memory_space<vmem>>, %arg6: memref<1x128x48xf32, #tpu.memory_space<vmem>>) attributes {dimension_semantics = [#tpu.dimension_semantics<parallel>, #tpu.dimension_semantics<parallel>, #tpu.dimension_semantics<arbitrary>], iteration_bounds = array<i64: 2, 2, 2>, scalar_prefetch = 0 : i64, scratch_operands = 0 : i64, tpu.core_type = #tpu.core_type<tc>, window_params = [{transform_indices = @transform_0, window_bounds = array<i64: 1, 128, 32>}, {transform_indices = @transform_1, window_bounds = array<i64: 1, 128, 32>}, {transform_indices = @transform_2, window_bounds = array<i64: 1, 128, 48>}, {transform_indices = @transform_3, window_bounds = array<i64: 1, 128, 48>}]} {
    %c0_i32 = arith.constant 0 : i32
    %0 = arith.cmpi eq, %arg2, %c0_i32 : i32
    %1 = arith.extui %0 : i1 to i32
    %c0_i32_0 = arith.constant 0 : i32
    %2 = arith.cmpi ne, %1, %c0_i32_0 : i32
    scf.if %2 {
      %cst_17 = arith.constant 0.000000e+00 : f32
      %20 = vector.broadcast %cst_17 : f32 to vector<128x48xf32>
      %c0_18 = arith.constant 0 : index
      %c0_19 = arith.constant 0 : index
      %c0_20 = arith.constant 0 : index
      %21 = vector.load %arg6[%c0_18, %c0_19, %c0_20] : memref<1x128x48xf32, #tpu.memory_space<vmem>>, vector<1x128x48xf32>
      %22 = vector.shape_cast %21 : vector<1x128x48xf32> to vector<128x48xf32>
      %23 = vector.shape_cast %20 : vector<128x48xf32> to vector<1x128x48xf32>
      tpu.vector_store %arg6[%c0_18, %c0_19, %c0_20], %23 {strides = array<i32>} : memref<1x128x48xf32, #tpu.memory_space<vmem>>, vector<1x128x48xf32>,
    } else {
    }
    %c0 = arith.constant 0 : index
    %c0_1 = arith.constant 0 : index
    %c0_2 = arith.constant 0 : index
    %3 = vector.load %arg3[%c0, %c0_1, %c0_2] : memref<1x128x32xf32, #tpu.memory_space<vmem>>, vector<1x128x32xf32>
    %4 = vector.shape_cast %3 : vector<1x128x32xf32> to vector<128x32xf32>
    %c0_3 = arith.constant 0 : index
    %c0_4 = arith.constant 0 : index
    %c0_5 = arith.constant 0 : index
    %5 = vector.load %arg4[%c0_3, %c0_4, %c0_5] : memref<1x128x32xf32, #tpu.memory_space<vmem>>, vector<1x128x32xf32>
    %6 = vector.shape_cast %5 : vector<1x128x32xf32> to vector<128x32xf32>
    %cst = arith.constant dense<0.000000e+00> : vector<128x128xf32>
    %7 = tpu.matmul %4, %6, %cst {dimension_numbers = #tpu.dot_dimension_numbers<[1], [1], [0], [0], [0, 0, 1, 0], [], []>} : vector<128x32xf32>, vector<128x32xf32>, vector<128x128xf32> -> vector<128x128xf32>
    %cst_6 = arith.constant 0.000000e+00 : f32
    %8 = vector.broadcast %cst_6 : f32 to vector<128x128xf32>
    %9 = arith.maximumf %7, %8 : vector<128x128xf32>
    %10 = arith.mulf %9, %9 : vector<128x128xf32>
    %c0_7 = arith.constant 0 : index
    %c0_8 = arith.constant 0 : index
    %c0_9 = arith.constant 0 : index
    %11 = vector.load %arg6[%c0_7, %c0_8, %c0_9] : memref<1x128x48xf32, #tpu.memory_space<vmem>>, vector<1x128x48xf32>
    %12 = vector.shape_cast %11 : vector<1x128x48xf32> to vector<128x48xf32>
    %c0_10 = arith.constant 0 : index
    %c0_11 = arith.constant 0 : index
    %c0_12 = arith.constant 0 : index
    %13 = vector.load %arg5[%c0_10, %c0_11, %c0_12] : memref<1x128x48xf32, #tpu.memory_space<vmem>>, vector<1x128x48xf32>
    %14 = vector.shape_cast %13 : vector<1x128x48xf32> to vector<128x48xf32>
    %cst_13 = arith.constant dense<0.000000e+00> : vector<128x48xf32>
    %15 = tpu.matmul %10, %14, %cst_13 {dimension_numbers = #tpu.dot_dimension_numbers<[1], [0], [0], [1], [0, 0, 1, 1], [], []>} : vector<128x128xf32>, vector<128x48xf32>, vector<128x48xf32> -> vector<128x48xf32>
    %16 = arith.addf %12, %15 : vector<128x48xf32>
    %c0_14 = arith.constant 0 : index
    %c0_15 = arith.constant 0 : index
    %c0_16 = arith.constant 0 : index
    %17 = vector.load %arg6[%c0_14, %c0_15, %c0_16] : memref<1x128x48xf32, #tpu.memory_space<vmem>>, vector<1x128x48xf32>
    %18 = vector.shape_cast %17 : vector<1x128x48xf32> to vector<128x48xf32>
    %19 = vector.shape_cast %16 : vector<128x48xf32> to vector<1x128x48xf32>
    tpu.vector_store %arg6[%c0_14, %c0_15, %c0_16], %19 {strides = array<i32>} : memref<1x128x48xf32, #tpu.memory_space<vmem>>, vector<1x128x48xf32>,
    return
  }
  func.func @transform_0(%arg0: i32, %arg1: i32, %arg2: i32) -> (i32, i32, i32) {
    %c0_i32 = arith.constant 0 : i32
    %c0_i32_0 = arith.constant 0 : i32
    return %arg0, %arg1, %c0_i32 : i32, i32, i32
  }
  func.func @transform_1(%arg0: i32, %arg1: i32, %arg2: i32) -> (i32, i32, i32) {
    %c0_i32 = arith.constant 0 : i32
    %c0_i32_0 = arith.constant 0 : i32
    return %arg0, %arg2, %c0_i32 : i32, i32, i32
  }
  func.func @transform_2(%arg0: i32, %arg1: i32, %arg2: i32) -> (i32, i32, i32) {
    %c0_i32 = arith.constant 0 : i32
    %c0_i32_0 = arith.constant 0 : i32
    return %arg0, %arg2, %c0_i32 : i32, i32, i32
  }
  func.func @transform_3(%arg0: i32, %arg1: i32, %arg2: i32) -> (i32, i32, i32) {
    %c0_i32 = arith.constant 0 : i32
    %c0_i32_0 = arith.constant 0 : i32
    return %arg0, %arg1, %c0_i32 : i32, i32, i32
  }
}

</mosaic_0001>

<bundles_post_ra>
// kernel: ppm_forward.1
= control target key start
LH: loop header
LB: loop body
LE: loop exit
PB: predicated region body
PF: predicated region fallthrough
CT: control target
= control target key end

     0   :  { %8 = vsyncpa [#allocation3], 0  ;;  %s1858_s0 = inlined_call_operand.vmem [shape: f32[2,256,32], index: 0, kind: input, shape index: {}, may-alias: {0,1}]   ;;  %s1859_s1 = inlined_call_operand.vmem [shape: f32[2,256,32], index: 1, kind: input, shape index: {}, may-alias: {0,1}]   ;;  %s1860_s2 = inlined_call_operand.vmem [shape: f32[2,256,48], index: 2, kind: input, shape index: {}]   ;;  %s1861_s3 = inlined_call_operand.hbm [shape: f32[2,256,48], index: 3, kind: output, shape index: {}]  }
   0x1   :  { %10 = vsyncpa [#allocation3 + $0x1], 0  ;;  %s1492_s12 = smov 0   ;;  %s1494_s13 = smov 0  }
   0x2   :  { %s1496_s14 = smov 0   ;;  %s1498_s15 = smov 0  }
   0x3   :  { %s1500_s16 = smov 0   ;;  %s1502_s17 = smov 0  }
   0x4   :  { %s1504_s18 = smov 0   ;;  %s1506_s19 = smov 0  }
   0x5   :  { %s1508_s20 = smov 0   ;;  %s1510_s21 = smov 0  }
   0x6 LB: > { %1868 = sst [smem:[#allocation5_spill]] %s1454_s18  ;;  %s956_s22 = sadd.s32 4294967295, %s1466_s21   ;;  %s1466_s21 = sphi %s1510_s21, %s16_s21   ;;  %s1462_s20 = sphi %s1508_s20, %s1884_s20   ;;  %s1458_s19 = sphi %s1506_s19, %s1883_s19   ;;  %s1454_s18 = sphi %s1504_s18, %s1882_s18   ;;  %s1450_s17 = sphi %s1502_s17, %s1881_s17   ;;  %s1446_s16 = sphi %s1500_s16, %s1880_s16   ;;  %s1442_s15 = sphi %s1498_s15, %s1879_s15   ;;  %s1438_s14 = sphi %s1496_s14, %s1887_s14   ;;  %s1434_s13 = sphi %s1494_s13, %s1886_s13   ;;  %s1430_s12 = sphi %s1492_s12, %s1885_s12  }
   0x7   : > { %1869 = sst [smem:[#allocation6_spill]] %s1458_s19  ;;  %s957_s23 = sadd.s32 4294967294, %s1466_s21  }
   0x8   : > { %1870 = sst [smem:[#allocation7_spill]] %s1462_s20  ;;  %s28_s24 = sadd.s32 1, %s1454_s18 }
   0x9   : > { %p29_p0 = scmp.ge.s32.totalorder %s28_s24, 2  ;;  %s31_s25 = sadd.s32 1, %s1458_s19 }
   0xa   : > { %s35_s26 = sadd.s32 1, %s1462_s20  ;;  %p138_p1 = scmp.ne.s32.totalorder %s1438_s14, %s1434_s13 }
   0xb   : > { %s1889_s24 = smov (%p29_p0, %s28_s24), 0  ;;  %s1891_s25 = smov (!%p29_p0, %s31_s25), %s1458_s19 }
   0xc   : > { %1871 = sst [smem:[#allocation8_spill]] %s1889_s24  ;;  %p139_p2 = scmp.eq.s32.totalorder %s956_s22, 7 }
   0xd   : > { %p144_p3 = scmp.ne.s32.totalorder %s1434_s13, %s1430_s12  ;;  %p33_p4 = scmp.ge.s32.totalorder %s1891_s25, 2 }
   0xe   : > { %p145_p5 = scmp.eq.s32.totalorder %s957_s23, 7  ;;  %p1554_p6 = por %p139_p2, %p138_p1 }
   0xf   : > { %s1893_s25 = smov (%p33_p4, %s1891_s25), 0  ;;  %s1895_s26 = smov (!%p33_p4, %s35_s26), %s1462_s20 }
  0x10   : > { %1873 = sst [smem:[#allocation9_spill]] %s1893_s25  ;;  %p1561_p7 = por %p145_p5, %p144_p3 }
  0x11   : > { %p960_p8 = scmp.ge.s32.totalorder %s1466_s21, 1  ;;  %p37_p9 = scmp.ge.s32.totalorder %s1895_s26, 2 }
  0x12   : > { %p202_p10 = scmp.lt.s32.totalorder %s1466_s21, 9  ;;  %s124_s29 = ssub.s32 %s1458_s19, %s1893_s25 }
  0x13   : > { %s1897_s26 = smov (%p37_p9, %s1895_s26), 0  ;;  %s128_s5 = sadd.s32 1, %s1438_s14 }
  0x14   : > { %1875 = sst [smem:[#allocation10_spill]] %s1897_s26  ;;  %p203_p11 = pnand %p960_p8, %p202_p10 }
  0x15   : > { %s123_s30 = ssub.s32 %s1462_s20, %s1897_s26  ;;  %s1865_s7 = sand.u32 (!%p203_p11), 1, %s1434_s13  }
  0x16   : > { %s125_s4 = sor.u32 %s124_s29, %s123_s30  ;;  %206 = sbr.rel (%p203_p11) target bundleno = 587 (0x24b), region = 32 }
  0x17   : > { %p126_p12 = scmp.eq.s32.totalorder %s125_s4, 0  ;;  %s1579_s8 = sshll.u32 (!%p203_p11), %s1446_s16, 4 }
  0x18   : > { %s961_s9 = sshll.u32 (!%p203_p11), %s1865_s7, 7  ;;  %p249_p13 = scmp.lt.s32.totalorder (!%p203_p11), %s1450_s17, 1 }
  0x19   : > { %s1575_s6 = scalar_select %p126_p12, %s1438_s14, %s128_s5  }
  0x1a   : > { %p251_p0 = scmp.lt.s32.totalorder (!%p203_p11), %s1579_s8, 31  ;;  %s965_s23 = sshll.u32 (!%p203_p11), %s1442_s15, 4 }
  0x1b   : > { %p261_p1 = scmp.lt.s32.totalorder (!%p203_p11), %s965_s23, 31  ;;  %p971_p2 = scmp.ne.s32.totalorder (!%p203_p11), %s1442_s15, 0 }
  0x1d   : > { %s250_s10 = scalar_select %p249_p13, %s1450_s17, 1 }
  0x1e   : > { %s252_s11 = scalar_select %p251_p0, %s1579_s8, 31 }
  0x1f   : > { %s963_s22 = sshll.u32 %s250_s10, 5  ;;  %s1899_s23 = smov (!%p261_p1, %s965_s23), 31  ;;  %vm283_vm0 = vcmask (!%p971_p2), 392192   ;;  %v1468_v0 = vmov (!%p971_p2), 0.0  }
  0x20   : > { %s254_s29 = sadd.s32 %s963_s22, %s252_s11  ;;  %s264_s16 = sadd.s32 %s963_s22, %s1899_s23 }
  0x21   : > { %s964_s30 = sshll.u32 %s254_s29, 3  ;;  %s967_s25 = sshll.u32 %s264_s16, 3 }
  0x22   : > { %s1591_s26 = scalar_lea.vmem %s1858_s0, %s964_s30  ;;  %s1596_s7 = scalar_lea.vmem %s1859_s1, %s967_s25 }
  0x23   : > { %s1601_s10 = scalar_lea.vmem %s1860_s2, %s967_s25  ;;  %s1603_s11 = scalar_lea.vmem [#allocation2], %s961_s9 }
  0x24   : > { %282 = sbr.rel (%p971_p2) target bundleno = 44 (0x2c), region = 36  ;;  %284 = vst.msk [vmem:[%s1603_s11] sm:$0xff] (!%p971_p2), %vm283_vm0, %v1468_v0  ;;  %285 = vst.msk [vmem:[%s1603_s11 + $0x8] sm:$0xff] (!%p971_p2), %vm283_vm0, %v1468_v0 }
  0x25   : > { %286 = vst.msk [vmem:[%s1603_s11 + $0x10] sm:$0xff] (!%p971_p2), %vm283_vm0, %v1468_v0  ;;  %287 = vst.msk [vmem:[%s1603_s11 + $0x18] sm:$0xff] (!%p971_p2), %vm283_vm0, %v1468_v0 }
  0x26   : > { %288 = vst.msk [vmem:[%s1603_s11 + $0x20] sm:$0xff] (!%p971_p2), %vm283_vm0, %v1468_v0  ;;  %289 = vst.msk [vmem:[%s1603_s11 + $0x28] sm:$0xff] (!%p971_p2), %vm283_vm0, %v1468_v0 }
  0x27   : > { %290 = vst.msk [vmem:[%s1603_s11 + $0x30] sm:$0xff] (!%p971_p2), %vm283_vm0, %v1468_v0  ;;  %291 = vst.msk [vmem:[%s1603_s11 + $0x38] sm:$0xff] (!%p971_p2), %vm283_vm0, %v1468_v0 }
  0x28   : > { %292 = vst.msk [vmem:[%s1603_s11 + $0x40] sm:$0xff] (!%p971_p2), %vm283_vm0, %v1468_v0  ;;  %293 = vst.msk [vmem:[%s1603_s11 + $0x48] sm:$0xff] (!%p971_p2), %vm283_vm0, %v1468_v0 }
  0x29   : > { %294 = vst.msk [vmem:[%s1603_s11 + $0x50] sm:$0xff] (!%p971_p2), %vm283_vm0, %v1468_v0  ;;  %295 = vst.msk [vmem:[%s1603_s11 + $0x58] sm:$0xff] (!%p971_p2), %vm283_vm0, %v1468_v0 }
  0x2a   : > { %296 = vst.msk [vmem:[%s1603_s11 + $0x60] sm:$0xff] (!%p971_p2), %vm283_vm0, %v1468_v0  ;;  %297 = vst.msk [vmem:[%s1603_s11 + $0x68] sm:$0xff] (!%p971_p2), %vm283_vm0, %v1468_v0 }
  0x2b   : > { %298 = vst.msk [vmem:[%s1603_s11 + $0x70] sm:$0xff] %vm283_vm0, %v1468_v0  ;;  %299 = vst.msk [vmem:[%s1603_s11 + $0x78] sm:$0xff] %vm283_vm0, %v1468_v0 }
  0x2c PF: > { %v316_v1 = vld [vmem:[%s1596_s7] sm:$0xff]  ;;  %v317_v2 = vld [vmem:[%s1596_s7 + $0x8] sm:$0xff]  ;;  %vm332_vm1 = vcmask 261120   ;;  %v318_v3 = vld [vmem:[%s1596_s7 + $0x10] sm:$0xff]  ;;  %vm799_vm3 = vcmask 392192   ;;  %s1006_s15 = sshll.u32 %s1450_s17, 5 }
  0x2d   : > { %v1186_v4 = vpack.c.bf16 %v317_v2, %v316_v1  ;;  %vm1643_vm2 = vmpackc.low %vm332_vm1, %vm332_vm1  ;;  %v319_v6 = vld [vmem:[%s1596_s7 + $0x18] sm:$0xff]  ;;  %v300_v8 = vld [vmem:[%s1591_s26] sm:$0xff]  ;;  %s829_s18 = sadd.s32 %s1006_s15, %s1579_s8  ;;  %s832_s19 = sshll.u32 %s1603_s11, 4  ;;  %s1792_s19 = int_to_ptr.vmem [resolvable:$true] %s832_s19 }
  0x2e   : > { %v1192_v7 = vpack.c.bf16 %v319_v6, %v318_v3  ;;  %v320_v9 = vld [vmem:[%s1596_s7 + $0x20] sm:$0xff]  ;;  %v321_v10 = vld [vmem:[%s1596_s7 + $0x28] sm:$0xff]  ;;  %1106 = vmatprep.mubr.msk.f32.mxu0 %vm332_vm1, %v300_v8  ;;  %v624_v14 = vld [vmem:[%s1601_s10 + $0x10] sm:$0xff]  ;;  %s1007_s17 = sshll.u32 %s829_s18, 7  ;;  %s1356_s8 = scalar_lea.vmem %s1792_s19, 2048 }
  0x2f   : > { %1188 = vmatprep.subr.msk.bf16.mxu0 %vm1643_vm2, %v1186_v4  ;;  %v1198_v11 = vpack.c.bf16 %v321_v10, %v320_v9  ;;  %v622_v12 = vld [vmem:[%s1601_s10] sm:$0xff]  ;;  %v623_v13 = vld [vmem:[%s1601_s10 + $0x8] sm:$0xff]  ;;  %v625_v16 = vld [vmem:[%s1601_s10 + $0x18] sm:$0xff]  ;;  %s1790_s25 = scalar_lea.hbm %s1861_s3, %s1007_s17  ;;  %p1357_p3 = scmp.ne.s32.totalorder %s1792_s19, %s1356_s8 }
  0x30   : > { %1191 = vmatpush3.bf16.xpose.msk.msra.mxu0 %vm1643_vm2, %v1186_v4  ;;  %v1234_v15 = vpack.c.bf16 %v623_v13, %v622_v12  ;;  %v1238_v17 = vpack.c.bf16 %v625_v16, %v624_v14  ;;  %v626_v18 = vld [vmem:[%s1601_s10 + $0x20] sm:$0xff]  ;;  %v627_v19 = vld [vmem:[%s1601_s10 + $0x28] sm:$0xff]  ;;  %v322_v20 = vld [vmem:[%s1596_s7 + $0x30] sm:$0xff]  ;;  %s1469_s9 = smov [#allocation2]  }
  0x31   : > { %1194 = vmatprep.subr.msk.bf16.mxu0 %vm1643_vm2, %v1192_v7  ;;  %v323_v21 = vld [vmem:[%s1596_s7 + $0x38] sm:$0xff]  ;;  %v1242_v22 = vpack.c.bf16 %v627_v19, %v626_v18  ;;  %v628_v24 = vld [vmem:[%s1601_s10 + $0x30] sm:$0xff]  ;;  %v630_v27 = vld [vmem:[%s1601_s10 + $0x40] sm:$0xff]  ;;  %p1358_p4 = pnand %p1357_p3, %p1554_p6  ;;  %s1360_s22 = sshll.u32 %s1469_s9, 4  ;;  %s1361_s22 = int_to_ptr.vmem [resolvable:$false] %s1360_s22 }
  0x32   : > { %1235 = vmatprep.subr.bf16.mxu1 %v1234_v15  ;;  %v1204_v23 = vpack.c.bf16 %v323_v21, %v322_v20  ;;  %v629_v25 = vld [vmem:[%s1601_s10 + $0x38] sm:$0xff]  ;;  %v631_v28 = vld [vmem:[%s1601_s10 + $0x48] sm:$0xff]  ;;  %v324_v29 = vld [vmem:[%s1596_s7 + $0x40] sm:$0xff]  ;;  %s1362_s23 = scalar_lea.vmem %s1361_s22, 4096  ;;  %p1363_p8 = scmp.lt.s32.totalorder %s1792_s19, %s1361_s22 }
  0x33   : > { %1237 = vmatpush3.bf16.msra.mxu1 %v1234_v15  ;;  %v1246_v26 = vpack.c.bf16 %v629_v25, %v628_v24  ;;  %v325_v30 = vld [vmem:[%s1596_s7 + $0x48] sm:$0xff]  ;;  %v1250_v31 = vpack.c.bf16 %v631_v28, %v630_v27  ;;  %v632_v33 = vld [vmem:[%s1601_s10 + $0x50] sm:$0xff]  ;;  %v633_v34 = vld [vmem:[%s1601_s10 + $0x58] sm:$0xff]  ;;  %p1359_p5 = pneg %p1358_p4  ;;  %p1364_p9 = scmp.lt.s32.totalorder %s1362_s23, %s1356_s8 }
  0x34   : > { %1239 = vmatprep.subr.bf16.mxu1 %v1238_v17  ;;  %v1210_v32 = vpack.c.bf16 %v325_v30, %v324_v29  ;;  %v1254_v35 = vpack.c.bf16 %v633_v34, %v632_v33  ;;  %v634_v36 = vld [vmem:[%s1601_s10 + $0x60] sm:$0xff]  ;;  %v635_v37 = vld [vmem:[%s1601_s10 + $0x68] sm:$0xff]  ;;  %v326_v38 = vld [vmem:[%s1596_s7 + $0x50] sm:$0xff] }
  0x35   : > { %v327_v39 = vld [vmem:[%s1596_s7 + $0x58] sm:$0xff]  ;;  %v1258_v40 = vpack.c.bf16 %v635_v37, %v634_v36  ;;  %v328_v42 = vld [vmem:[%s1596_s7 + $0x60] sm:$0xff]  ;;  %v329_v43 = vld [vmem:[%s1596_s7 + $0x68] sm:$0xff]  ;;  %p1365_p10 = por %p1364_p9, %p1363_p8 }
  0x36   : > { %v1216_v41 = vpack.c.bf16 %v327_v39, %v326_v38  ;;  %v1222_v44 = vpack.c.bf16 %v329_v43, %v328_v42  ;;  %v330_v45 = vld [vmem:[%s1596_s7 + $0x70] sm:$0xff]  ;;  %v331_v46 = vld [vmem:[%s1596_s7 + $0x78] sm:$0xff]  ;;  %v301_v48 = vld [vmem:[%s1591_s26 + $0x8] sm:$0xff] }
  0x37   : > { %1241 = vmatpush3.bf16.msra.mxu1 %v1238_v17  ;;  %v1228_v47 = vpack.c.bf16 %v331_v46, %v330_v45  ;;  %v302_v49 = vld [vmem:[%s1591_s26 + $0x10] sm:$0xff]  ;;  %v303_v50 = vld [vmem:[%s1591_s26 + $0x18] sm:$0xff]  ;;  %v304_v51 = vld [vmem:[%s1591_s26 + $0x20] sm:$0xff]  ;;  %p1366_p11 = pnand %p1365_p10, %p1359_p5 }
  0x38   : > { %1197 = vmatpush3.bf16.xpose.msk.msra.mxu0 %vm1643_vm2, %v1192_v7  ;;  %1243 = vmatprep.subr.bf16.mxu1 %v1242_v22  ;;  %v305_v52 = vld [vmem:[%s1591_s26 + $0x28] sm:$0xff]  ;;  %v306_v53 = vld [vmem:[%s1591_s26 + $0x30] sm:$0xff]  ;;  %v307_v54 = vld [vmem:[%s1591_s26 + $0x38] sm:$0xff] }
  0x39   : > { %1200 = vmatprep.subr.msk.bf16.mxu0 %vm1643_vm2, %v1198_v11  ;;  %v308_v55 = vld [vmem:[%s1591_s26 + $0x40] sm:$0xff]  ;;  %v309_v56 = vld [vmem:[%s1591_s26 + $0x48] sm:$0xff]  ;;  %v310_v57 = vld [vmem:[%s1591_s26 + $0x50] sm:$0xff] }
  0x3a   : > { %v311_v58 = vld [vmem:[%s1591_s26 + $0x58] sm:$0xff]  ;;  %v312_v59 = vld [vmem:[%s1591_s26 + $0x60] sm:$0xff]  ;;  %v313_v60 = vld [vmem:[%s1591_s26 + $0x68] sm:$0xff] }
  0x3b   : > { %1245 = vmatpush3.bf16.msra.mxu1 %v1242_v22  ;;  %v314_v61 = vld [vmem:[%s1591_s26 + $0x70] sm:$0xff]  ;;  %v315_v62 = vld [vmem:[%s1591_s26 + $0x78] sm:$0xff]  ;;  %s1878_s26 = sand.u32 1, %s1434_s13  }
  0x3c   : > { %1247 = vmatprep.subr.bf16.mxu1 %v1246_v26  ;;  %v636_v63 = vld [vmem:[%s1601_s10 + $0x70] sm:$0xff]  ;;  %v637_v0 = vld [vmem:[%s1601_s10 + $0x78] sm:$0xff]  ;;  %s1800_s7 = scalar_lea.sflag [#allocation3], %s1878_s26 }
  0x3d   : > { %v1262_v1 = vpack.c.bf16 %v637_v0, %v636_v63  ;;  %v610_v63 = vld [vmem:[%s1603_s11 + $0x20] sm:$0xff] }
  0x3f   : > { %1249 = vmatpush3.bf16.msra.mxu1 %v1246_v26 }
  0x40   : > { %1203 = vmatpush3.bf16.xpose.msk.msra.mxu0 %vm1643_vm2, %v1198_v11  ;;  %1251 = vmatprep.subr.bf16.mxu1 %v1250_v31 }
  0x41   : > { %1206 = vmatprep.subr.msk.bf16.mxu0 %vm1643_vm2, %v1204_v23 }
  0x43   : > { %1253 = vmatpush3.bf16.msra.mxu1 %v1250_v31 }
  0x44   : > { %1255 = vmatprep.subr.bf16.mxu1 %v1254_v35 }
  0x47   : > { %1257 = vmatpush3.bf16.msra.mxu1 %v1254_v35 }
  0x48   : > { %1209 = vmatpush3.bf16.xpose.msk.msra.mxu0 %vm1643_vm2, %v1204_v23  ;;  %1259 = vmatprep.subr.bf16.mxu1 %v1258_v40 }
  0x49   : > { %1212 = vmatprep.subr.msk.bf16.mxu0 %vm1643_vm2, %v1210_v32 }
  0x4b   : > { %1261 = vmatpush3.bf16.msra.mxu1 %v1258_v40 }
  0x4c   : > { %1263 = vmatprep.subr.bf16.mxu1 %v1262_v1 }
  0x4f   : > { %1265 = vmatpush3.bf16.msra.mxu1 %v1262_v1 }
  0x50   : > { %1215 = vmatpush3.bf16.xpose.msk.msra.mxu0 %vm1643_vm2, %v1210_v32 }
  0x51   : > { %1218 = vmatprep.subr.msk.bf16.mxu0 %vm1643_vm2, %v1216_v41 }
  0x58   : > { %1221 = vmatpush3.bf16.xpose.msk.msra.mxu0 %vm1643_vm2, %v1216_v41 }
  0x59   : > { %1224 = vmatprep.subr.msk.bf16.mxu0 %vm1643_vm2, %v1222_v44 }
  0x60   : > { %1227 = vmatpush3.bf16.xpose.msk.msra.mxu0 %vm1643_vm2, %v1222_v44 }
  0x61   : > { %1230 = vmatprep.subr.msk.bf16.mxu0 %vm1643_vm2, %v1228_v47 }
  0x68   : > { %1233 = vmatpush3.bf16.xpose.msk.msra.mxu0 %vm1643_vm2, %v1228_v47 }
  0x6f   : > { %1107 = vmatmul.mubr.msk.f32.vlgmr.msra.gmra.mrb[0].mxu0 %vm332_vm1, %v301_v48 }
  0x70   : > { %1109 = vmatprep.mubr.msk.f32.mxu0 %vm332_vm1, %v302_v49 }
  0x73   : > { %1110 = vmatmul.mubr.msk.f32.gmra.mrb[2].mxu0 %vm332_vm1, %v303_v50  ;;  %v607_v50 = vld [vmem:[%s1603_s11 + $0x8] sm:$0xff] }
  0x74   : > { %1112 = vmatprep.mubr.msk.f32.mxu0 %vm332_vm1, %v304_v51  ;;  %v606_v51 = vld [vmem:[%s1603_s11] sm:$0xff] }
  0x77   : > { %1113 = vmatmul.mubr.msk.f32.gmra.mrb[4].mxu0 %vm332_vm1, %v305_v52 }
  0x78   : > { %1115 = vmatprep.mubr.msk.f32.mxu0 %vm332_vm1, %v306_v53 }
  0x7b   : > { %1116 = vmatmul.mubr.msk.f32.gmra.mrb[6].mxu0 %vm332_vm1, %v307_v54 }
  0x7c   : > { %1118 = vmatprep.mubr.msk.f32.mxu0 %vm332_vm1, %v308_v55 }
  0x7f   : > { %1119 = vmatmul.mubr.msk.f32.gmra.mrb[8].mxu0 %vm332_vm1, %v309_v56  ;;  %v609_v56 = vld [vmem:[%s1603_s11 + $0x18] sm:$0xff] }
  0x80   : > { %1121 = vmatprep.mubr.msk.f32.mxu0 %vm332_vm1, %v310_v57  ;;  %v608_v57 = vld [vmem:[%s1603_s11 + $0x10] sm:$0xff] }
  0x83   : > { %1122 = vmatmul.mubr.msk.f32.gmra.mrb[10].mxu0 %vm332_vm1, %v311_v58 }
  0x84   : > { %1124 = vmatprep.mubr.msk.f32.mxu0 %vm332_vm1, %v312_v59 }
  0x87   : > { %1125 = vmatmul.mubr.msk.f32.gmra.mrb[12].mxu0 %vm332_vm1, %v313_v60 }
  0x88   : > { %1127 = vmatprep.mubr.msk.f32.mxu0 %vm332_vm1, %v314_v61 }
  0x8b   : > { %1128 = vmatmul.mubr.msk.f32.gmra.mrb[14].mxu0 %vm332_vm1, %v315_v62  ;;  %v611_v62 = vld [vmem:[%s1603_s11 + $0x28] sm:$0xff] }
 0x142   : > { %v1108_v2 = vpop.f32.mrb[0].mxu0 }
 0x143   : > { %v575_v3 = vmax.f32 %v1108_v2, 0.0  ;;  %v495_v4 = vpop.f32.mrb[1].mxu0 }
 0x144   : > { %v574_v5 = vmax.f32 %v495_v4, 0.0  ;;  %v613_v4 = vld [vmem:[%s1603_s11 + $0x38] sm:$0xff] }
 0x145   : > { %v591_v8 = vmul.f32 %v575_v3, %v575_v3 }
 0x146   : > { %v1111_v6 = vpop.f32.mrb[2].mxu0  ;;  %v590_v7 = vmul.f32 %v574_v5, %v574_v5  ;;  %v612_v5 = vld [vmem:[%s1603_s11 + $0x30] sm:$0xff] }
 0x147   : > { %v577_v9 = vmax.f32 %v1111_v6, 0.0  ;;  %v505_v10 = vpop.f32.mrb[3].mxu0 }
 0x148   : > { %v576_v11 = vmax.f32 %v505_v10, 0.0  ;;  %1162 = vmatprep.mubr.f32.mxu1 %v590_v7  ;;  %v615_v10 = vld [vmem:[%s1603_s11 + $0x48] sm:$0xff] }
 0x149   : > { %1163 = vmatmul.mubr.f32.vlgmr.msra.gmra.mrb[0].mxu1 %v591_v8  ;;  %v593_v14 = vmul.f32 %v577_v9, %v577_v9 }
 0x14a   : > { %v592_v12 = vmul.f32 %v576_v11, %v576_v11  ;;  %v1114_v13 = vpop.f32.mrb[4].mxu0  ;;  %v614_v11 = vld [vmem:[%s1603_s11 + $0x40] sm:$0xff] }
 0x14b   : > { %v579_v15 = vmax.f32 %v1114_v13, 0.0  ;;  %v515_v16 = vpop.f32.mrb[5].mxu0 }
 0x14c   : > { %v578_v17 = vmax.f32 %v515_v16, 0.0  ;;  %1165 = vmatprep.mubr.f32.mxu1 %v592_v12  ;;  %v617_v16 = vld [vmem:[%s1603_s11 + $0x58] sm:$0xff] }
 0x14d   : > { %1166 = vmatmul.mubr.f32.gmra.mrb[2].mxu1 %v593_v14  ;;  %v595_v20 = vmul.f32 %v579_v15, %v579_v15 }
 0x14e   : > { %v594_v18 = vmul.f32 %v578_v17, %v578_v17  ;;  %v1117_v19 = vpop.f32.mrb[6].mxu0  ;;  %v616_v17 = vld [vmem:[%s1603_s11 + $0x50] sm:$0xff] }
 0x14f   : > { %v581_v21 = vmax.f32 %v1117_v19, 0.0  ;;  %v525_v22 = vpop.f32.mrb[7].mxu0 }
 0x150   : > { %v580_v23 = vmax.f32 %v525_v22, 0.0  ;;  %1168 = vmatprep.mubr.f32.mxu1 %v594_v18  ;;  %v619_v22 = vld [vmem:[%s1603_s11 + $0x68] sm:$0xff] }
 0x151   : > { %1169 = vmatmul.mubr.f32.gmra.mrb[4].mxu1 %v595_v20  ;;  %v597_v26 = vmul.f32 %v581_v21, %v581_v21 }
 0x152   : > { %v596_v24 = vmul.f32 %v580_v23, %v580_v23  ;;  %v1120_v25 = vpop.f32.mrb[8].mxu0  ;;  %v618_v23 = vld [vmem:[%s1603_s11 + $0x60] sm:$0xff] }
 0x153   : > { %v583_v27 = vmax.f32 %v1120_v25, 0.0  ;;  %v535_v28 = vpop.f32.mrb[9].mxu0 }
 0x154   : > { %v582_v29 = vmax.f32 %v535_v28, 0.0  ;;  %1171 = vmatprep.mubr.f32.mxu1 %v596_v24  ;;  %v621_v28 = vld [vmem:[%s1603_s11 + $0x78] sm:$0xff] }
 0x155   : > { %1172 = vmatmul.mubr.f32.gmra.mrb[6].mxu1 %v597_v26  ;;  %v599_v32 = vmul.f32 %v583_v27, %v583_v27 }
 0x156   : > { %v598_v30 = vmul.f32 %v582_v29, %v582_v29  ;;  %v1123_v31 = vpop.f32.mrb[10].mxu0  ;;  %v620_v29 = vld [vmem:[%s1603_s11 + $0x70] sm:$0xff] }
 0x157   : > { %v585_v33 = vmax.f32 %v1123_v31, 0.0  ;;  %v545_v34 = vpop.f32.mrb[11].mxu0 }
 0x158   : > { %v584_v35 = vmax.f32 %v545_v34, 0.0  ;;  %1174 = vmatprep.mubr.f32.mxu1 %v598_v30 }
 0x159   : > { %1175 = vmatmul.mubr.f32.gmra.mrb[8].mxu1 %v599_v32  ;;  %v601_v38 = vmul.f32 %v585_v33, %v585_v33 }
 0x15a   : > { %v600_v36 = vmul.f32 %v584_v35, %v584_v35  ;;  %v1126_v37 = vpop.f32.mrb[12].mxu0 }
 0x15b   : > { %v587_v39 = vmax.f32 %v1126_v37, 0.0  ;;  %v555_v40 = vpop.f32.mrb[13].mxu0 }
 0x15c   : > { %v586_v41 = vmax.f32 %v555_v40, 0.0  ;;  %1177 = vmatprep.mubr.f32.mxu1 %v600_v36 }
 0x15d   : > { %1178 = vmatmul.mubr.f32.gmra.mrb[10].mxu1 %v601_v38  ;;  %v603_v44 = vmul.f32 %v587_v39, %v587_v39 }
 0x15e   : > { %v602_v42 = vmul.f32 %v586_v41, %v586_v41  ;;  %v1129_v43 = vpop.f32.mrb[14].mxu0 }
 0x15f   : > { %v589_v45 = vmax.f32 %v1129_v43, 0.0  ;;  %v565_v46 = vpop.f32.mrb[15].mxu0 }
 0x160   : > { %v588_v47 = vmax.f32 %v565_v46, 0.0  ;;  %1180 = vmatprep.mubr.f32.mxu1 %v602_v42 }
 0x161   : > { %1181 = vmatmul.mubr.f32.gmra.mrb[12].mxu1 %v603_v44  ;;  %v605_v49 = vmul.f32 %v589_v45, %v589_v45 }
 0x162   : > { %v604_v48 = vmul.f32 %v588_v47, %v588_v47 }
 0x164   : > { %1183 = vmatprep.mubr.f32.mxu1 %v604_v48 }
 0x165   : > { %1184 = vmatmul.mubr.f32.gmra.mrb[14].mxu1 %v605_v49 }
 0x21c   : > { %v1164_v52 = vpop.f32.mrb[0].mxu1 }
 0x21d   : > { %v784_v53 = vadd.f32 %v1164_v52, %v607_v50  ;;  %v704_v54 = vpop.f32.mrb[1].mxu1 }
 0x21e   : > { %v783_v55 = vadd.f32 %v704_v54, %v606_v51 }
 0x21f   : > { %801 = vst.msk [vmem:[%s1603_s11 + $0x8] sm:$0xff] %vm799_vm3, %v784_v53 }
 0x220   : > { %800 = vst.msk [vmem:[%s1603_s11] sm:$0xff] %vm799_vm3, %v783_v55  ;;  %v1167_v58 = vpop.f32.mrb[2].mxu1 }
 0x221   : > { %v786_v59 = vadd.f32 %v1167_v58, %v609_v56  ;;  %v714_v60 = vpop.f32.mrb[3].mxu1 }
 0x222   : > { %v785_v61 = vadd.f32 %v714_v60, %v608_v57 }
 0x223   : > { %803 = vst.msk [vmem:[%s1603_s11 + $0x18] sm:$0xff] %vm799_vm3, %v786_v59 }
 0x224   : > { %802 = vst.msk [vmem:[%s1603_s11 + $0x10] sm:$0xff] %vm799_vm3, %v785_v61  ;;  %v1170_v0 = vpop.f32.mrb[4].mxu1 }
 0x225   : > { %v788_v1 = vadd.f32 %v1170_v0, %v611_v62  ;;  %v724_v2 = vpop.f32.mrb[5].mxu1 }
 0x226   : > { %v787_v3 = vadd.f32 %v724_v2, %v610_v63 }
 0x227   : > { %805 = vst.msk [vmem:[%s1603_s11 + $0x28] sm:$0xff] %vm799_vm3, %v788_v1 }
 0x228   : > { %804 = vst.msk [vmem:[%s1603_s11 + $0x20] sm:$0xff] %vm799_vm3, %v787_v3  ;;  %v1173_v6 = vpop.f32.mrb[6].mxu1 }
 0x229   : > { %v790_v7 = vadd.f32 %v1173_v6, %v613_v4  ;;  %v734_v8 = vpop.f32.mrb[7].mxu1 }
 0x22a   : > { %v789_v9 = vadd.f32 %v734_v8, %v612_v5 }
 0x22b   : > { %807 = vst.msk [vmem:[%s1603_s11 + $0x38] sm:$0xff] %vm799_vm3, %v790_v7 }
 0x22c   : > { %806 = vst.msk [vmem:[%s1603_s11 + $0x30] sm:$0xff] %vm799_vm3, %v789_v9  ;;  %v1176_v12 = vpop.f32.mrb[8].mxu1 }
 0x22d   : > { %v792_v13 = vadd.f32 %v1176_v12, %v615_v10  ;;  %v744_v14 = vpop.f32.mrb[9].mxu1 }
 0x22e   : > { %v791_v15 = vadd.f32 %v744_v14, %v614_v11 }
 0x22f   : > { %809 = vst.msk [vmem:[%s1603_s11 + $0x48] sm:$0xff] %vm799_vm3, %v792_v13 }
 0x230   : > { %808 = vst.msk [vmem:[%s1603_s11 + $0x40] sm:$0xff] %vm799_vm3, %v791_v15  ;;  %v1179_v18 = vpop.f32.mrb[10].mxu1 }
 0x231   : > { %v794_v19 = vadd.f32 %v1179_v18, %v617_v16  ;;  %v754_v20 = vpop.f32.mrb[11].mxu1 }
 0x232   : > { %v793_v21 = vadd.f32 %v754_v20, %v616_v17 }
 0x233   : > { %811 = vst.msk [vmem:[%s1603_s11 + $0x58] sm:$0xff] %vm799_vm3, %v794_v19 }
 0x234   : > { %810 = vst.msk [vmem:[%s1603_s11 + $0x50] sm:$0xff] %vm799_vm3, %v793_v21  ;;  %v1182_v24 = vpop.f32.mrb[12].mxu1 }
 0x235   : > { %v796_v25 = vadd.f32 %v1182_v24, %v619_v22  ;;  %v764_v26 = vpop.f32.mrb[13].mxu1 }
 0x236   : > { %v795_v27 = vadd.f32 %v764_v26, %v618_v23 }
 0x237   : > { %813 = vst.msk [vmem:[%s1603_s11 + $0x68] sm:$0xff] %vm799_vm3, %v796_v25 }
 0x238   : > { %812 = vst.msk [vmem:[%s1603_s11 + $0x60] sm:$0xff] %vm799_vm3, %v795_v27  ;;  %v1185_v30 = vpop.f32.mrb[14].mxu1 }
 0x239   : > { %v798_v31 = vadd.f32 %v1185_v30, %v621_v28  ;;  %v774_v32 = vpop.f32.mrb[15].mxu1 }
 0x23a   : > { %v797_v33 = vadd.f32 %v774_v32, %v620_v29 }
 0x23b   : > { %815 = vst.msk [vmem:[%s1603_s11 + $0x78] sm:$0xff] %vm799_vm3, %v798_v31 }
 0x23c   : > { %814 = vst.msk [vmem:[%s1603_s11 + $0x70] sm:$0xff] %vm799_vm3, %v797_v33 }
 0x23d   : > { %1369 = shalt.err (!%p1366_p11)
}
 0x23e   : > { %s1370_s29 = scalar_lea.hbm %s1790_s25, 2048  ;;  %s1374_s5 = scalar_lea.hbm %s1861_s3, 8192 }
 0x23f   : > { %p1371_p12 = scmp.ne.s32.totalorder %s1790_s25, %s1370_s29  ;;  %p1375_p1 = scmp.lt.u32.totalorder %s1790_s25, %s1861_s3 }
 0x240   : > { %p1376_p2 = scmp.lt.u32.totalorder %s1374_s5, %s1370_s29  ;;  %p1378_p4 = scmp.lt.u32.totalorder %s1370_s29, %s1790_s25 }
 0x241   : > { %p1372_p13 = pnand %p1371_p12, %p1554_p6 }
 0x242   : > { %p1377_p3 = por %p1376_p2, %p1375_p1 }
 0x243   : > { %p1373_p0 = pneg %p1372_p13 }
 0x244   : > { %p1379_p5 = por %p1378_p4, %p1377_p3 }
 0x246   : > { %p1380_p8 = pnand %p1379_p5, %p1373_p0 }
 0x248   : > { %1383 = shalt.err (!%p1380_p8)
}
 0x249   : > { %s1470_s11 = smov 128   ;;  %s1471_s15 = smov 8  }
 0x24a   : > { %1266 = dma.vmem_to_hbm [thread:$0]  (%p1554_p6), %s1792_s19, 2048, %s1790_s25, %s1800_s7, %s1470_s11, %s1470_s11, %s1471_s15  }
 0x24b PF: > { %p1272_p9 = scmp.ge.s32.totalorder %s1466_s21, 2  ;;  %s847_s18 = sand.u32 1, %s1430_s12  }
 0x24c   : > { %s848_s17 = scalar_lea.sflag [#allocation3], %s847_s18 }
 0x24d   : > { %p1269_p10 = pnand %p1272_p9, %p1561_p7 }
 0x24f   : > { %1425 = dma.done.wait (!%p1269_p10), %s848_s17, 2048  }
 0x250   : > { %1427 = vsyncadd (!%p1269_p10), %s848_s17, 4294965248  ;;  %s16_s21 = sadd.s32 1, %s1466_s21   ;;  %s1879_s15 = sld [smem:[#allocation5_spill]] }
 0x251   : > { %p13_p11 = scmp.ge.s32.totalorder %s16_s21, 10   ;;  %s1880_s16 = sld [smem:[#allocation6_spill]] }
 0x252   : > { %s1881_s17 = sld [smem:[#allocation7_spill]]  ;;  %s1882_s18 = sld [smem:[#allocation8_spill]] }
 0x253   : > { %s1883_s19 = sld [smem:[#allocation9_spill]]  ;;  %s1884_s20 = sld [smem:[#allocation10_spill]] }
 0x254   : > { %s1885_s12 = smov %s1434_s13  ;;  %s1886_s13 = smov %s1438_s14 }
 0x255   : > { %s1887_s14 = smov %s1575_s6  ;;  %15 = sbr.rel (!%p13_p11) target bundleno = 6 (0x6), region = 77 }
 0x25c   :  { %853 = vsyncpa [#allocation3], 1 }
 0x25d   :  { %855 = vsyncpa [#allocation3 + $0x1], 1 }

</bundles_post_ra>
